<compile_context>
chip_gen: v6e
topology: v6e:2x2x1
jax: 0.10.0
libtpu: 0.0.40
codegen_flags: <defaults>
</compile_context>

<pallas_src>
import jax
import jax.numpy as jnp
import numpy as np
from jax import lax
from jax.experimental import pallas as pl
from jax.experimental.pallas import tpu as pltpu


def mpl2_kernel(h_ref, A_ref, mask_ref, wsq_ref, bias_ref, h_out_ref, A_out_ref):
    B, N, _ = A_ref.shape
    f32 = jnp.float32

    h = h_ref[...]                 # (B*N, H) f32
    biases = bias_ref[...]         # (8, H)   f32

    W1, W2, WA = wsq_ref[0], wsq_ref[1], wsq_ref[2]
    WIR, WIZ, WIN = wsq_ref[3], wsq_ref[4], wsq_ref[5]
    WHR, WHZ, WHN = wsq_ref[6], wsq_ref[7], wsq_ref[8]

    b1, b2 = biases[0:1, :], biases[1:2, :]
    bir, biz, bin_ = biases[2:3, :], biases[3:4, :], biases[4:5, :]
    bhr, bhz, bhn = biases[5:6, :], biases[6:7, :], biases[7:8, :]

    # ---- hidden-side GRU gate pre-activations (independent of the message;
    #      hoisted ahead of the message chain so the MXU pipeline stays fed) ----
    gh_r = jnp.dot(h, WHR, preferred_element_type=f32) + bhr
    gh_z = jnp.dot(h, WHZ, preferred_element_type=f32) + bhz
    gh_n = jnp.dot(h, WHN, preferred_element_type=f32) + bhn

    # ---- message embedding: 2-layer MLP (Linear + ReLU) on the (B*N, H) slab ----
    m = jnp.maximum(jnp.dot(h, W1, preferred_element_type=f32) + b1, 0.0)
    m = jnp.maximum(jnp.dot(m, W2, preferred_element_type=f32) + b2, 0.0)

    # ---- message = ReLU(A @ message(h)), per graph (batch unrolled; B is tiny) ----
    msgs = []
    for b in range(B):
        Ab = A_ref[b]                               # (N, N)
        mb = m[b * N:(b + 1) * N, :]                # (N, H) static, 8-aligned slice
        msgs.append(jnp.maximum(jnp.dot(Ab, mb, preferred_element_type=f32), 0.0))
    msg = jnp.concatenate(msgs, axis=0)             # (B*N, H)

    # ---- input-side gates + GRU blend (lane-aligned per-gate matmuls) ----
    gi_r = jnp.dot(msg, WIR, preferred_element_type=f32) + bir
    gi_z = jnp.dot(msg, WIZ, preferred_element_type=f32) + biz
    gi_n = jnp.dot(msg, WIN, preferred_element_type=f32) + bin_

    r = jax.nn.sigmoid(gi_r + gh_r)
    z = jax.nn.sigmoid(gi_z + gh_z)
    n = jnp.tanh(gi_n + r * gh_n)
    h_new = (1.0 - z) * n + z * h                   # (B*N, H)

    h_out_ref[...] = h_new.astype(h_out_ref.dtype)

    # ---- adjacency: sigmoid(h' W_A h'^T) * mask, without materializing h'.T ----
    hw = jnp.dot(h_new, WA, preferred_element_type=f32)       # (B*N, H)
    a_blocks = []
    for b in range(B):
        hb = h_new[b * N:(b + 1) * N, :]
        hwb = hw[b * N:(b + 1) * N, :]
        logits = lax.dot_general(hwb, hb,
                                 dimension_numbers=(((1,), (1,)), ((), ())),
                                 preferred_element_type=f32)  # (N, N)
        a_blocks.append(jax.nn.sigmoid(logits) * mask_ref[b])
    A_out_ref[...] = jnp.stack(a_blocks, axis=0).astype(A_out_ref.dtype)


def message_passing_layer2(h, A, mask, params):
    B, N, H = h.shape
    assert A.shape == (B, N, N) and mask.shape == (B, N, N)

    wih, whh = params["wih"], params["whh"]
    bih, bhh = params["bih"], params["bhh"]

    # Pack the 9 weight/bias arrays into two stacked operands (fewer, larger DMAs;
    # also gives lane-aligned per-gate (H,H) GRU weights).
    W_sq = jnp.stack([
        params["w1"], params["w2"], params["wa"],
        wih[:, :H], wih[:, H:2 * H], wih[:, 2 * H:],
        whh[:, :H], whh[:, H:2 * H], whh[:, 2 * H:],
    ], axis=0).astype(jnp.float32)                            # (9, H, H)
    B_vec = jnp.stack([
        params["b1"][0], params["b2"][0],
        bih[0, :H], bih[0, H:2 * H], bih[0, 2 * H:],
        bhh[0, :H], bhh[0, H:2 * H], bhh[0, 2 * H:],
    ], axis=0).astype(jnp.float32)                            # (8, H)

    h_flat = h.reshape(B * N, H)

    # Advisory cost estimate so XLA schedules surrounding ops sensibly.
    mm = lambda m, k, n: 2 * m * k * n
    flops = (2 * mm(B * N, H, H)          # message MLP
             + B * mm(N, N, H)            # A @ m
             + 6 * mm(B * N, H, H)        # GRU gate matmuls
             + mm(B * N, H, H)            # h' @ W_A
             + B * mm(N, H, N))           # logits
    transcendentals = 3 * B * N * H + B * N * N
    bytes_accessed = 4 * (2 * h_flat.size + 2 * A.size + mask.size
                          + W_sq.size + B_vec.size)

    vmem = pl.BlockSpec(memory_space=pltpu.MemorySpace.VMEM)

    h_out_flat, A_out = pl.pallas_call(
        mpl2_kernel,
        out_shape=(
            jax.ShapeDtypeStruct((B * N, H), h.dtype),
            jax.ShapeDtypeStruct((B, N, N), A.dtype),
        ),
        in_specs=[vmem, vmem, vmem, vmem, vmem],
        out_specs=(vmem, vmem),
        cost_estimate=pl.CostEstimate(flops=flops,
                                      transcendentals=transcendentals,
                                      bytes_accessed=bytes_accessed),
    )(h_flat, A, mask, W_sq, B_vec)

    return h_out_flat.reshape(B, N, H), A_out


def reference_forward(h, A, mask, p):
    """Pure-JAX reference (same math as the kernel, unpacked params)."""
    H = h.shape[-1]
    m = jnp.maximum(h @ p["w1"] + p["b1"], 0.0)
    m = jnp.maximum(m @ p["w2"] + p["b2"], 0.0)
    msg = jnp.maximum(jnp.einsum("bij,bjh->bih", A, m), 0.0)
    gi = msg @ p["wih"] + p["bih"]
    gh = h @ p["whh"] + p["bhh"]
    r = jax.nn.sigmoid(gi[..., :H] + gh[..., :H])
    z = jax.nn.sigmoid(gi[..., H:2 * H] + gh[..., H:2 * H])
    n = jnp.tanh(gi[..., 2 * H:] + r * gh[..., 2 * H:])
    h_new = (1.0 - z) * n + z * h
    logits = jnp.einsum("bih,bjh->bij", h_new @ p["wa"], h_new)
    A_new = jax.nn.sigmoid(logits) * mask
    return h_new, A_new


if __name__ == "__main__":
    B, N, H = 2, 8, 32  # batch, nodes (seq), hidden

    key = jax.random.PRNGKey(0)
    keys = jax.random.split(key, 16)

    def init(k, shape, scale=0.1):
        return (scale * jax.random.normal(k, shape)).astype(jnp.float32)

    params = {
        "w1":  init(keys[0], (H, H)),
        "b1":  init(keys[1], (1, H)),
        "w2":  init(keys[2], (H, H)),
        "b2":  init(keys[3], (1, H)),
        "wih": init(keys[4], (H, 3 * H)),
        "whh": init(keys[5], (H, 3 * H)),
        "bih": init(keys[6], (1, 3 * H)),
        "bhh": init(keys[7], (1, 3 * H)),
        "wa":  init(keys[8], (H, H)),
    }

    h = init(keys[9], (B, N, H), scale=1.0)
    A_logits = init(keys[10], (B, N, N), scale=1.0)
    A = jax.nn.softmax(A_logits, axis=-1)

    # mask: valid-node outer-product mask per batch element
    lens = jnp.array([N, N - 2], dtype=jnp.int32)
    node_valid = (jnp.arange(N)[None, :] < lens[:, None]).astype(jnp.float32)  # (B, N)
    mask = node_valid[:, :, None] * node_valid[:, None, :]                      # (B, N, N)

    h_out, A_out = message_passing_layer2(h, A, mask, params)
    jax.block_until_ready((h_out, A_out))

    h_ref, A_ref = reference_forward(h, A, mask, params)
    np.testing.assert_allclose(np.asarray(h_out), np.asarray(h_ref), rtol=1e-5, atol=1e-5)
    np.testing.assert_allclose(np.asarray(A_out), np.asarray(A_ref), rtol=1e-5, atol=1e-5)

    print("KERNEL_OK")
</pallas_src>

<mosaic_0001>
module attributes {stable_mosaic.version = 11 : i64} {
  func.func @mpl2_kernel(%arg0: memref<16x32xf32, #tpu.memory_space<vmem>>, %arg1: memref<2x8x8xf32, #tpu.memory_space<vmem>>, %arg2: memref<2x8x8xf32, #tpu.memory_space<vmem>>, %arg3: memref<9x32x32xf32, #tpu.memory_space<vmem>>, %arg4: memref<8x32xf32, #tpu.memory_space<vmem>>, %arg5: memref<16x32xf32, #tpu.memory_space<vmem>>, %arg6: memref<2x8x8xf32, #tpu.memory_space<vmem>>) attributes {dimension_semantics = [], scalar_prefetch = 0 : i64, scratch_operands = 0 : i64, tpu.core_type = #tpu.core_type<tc>} {
    %c0 = arith.constant 0 : index
    %c0_0 = arith.constant 0 : index
    %0 = vector.load %arg0[%c0, %c0_0] : memref<16x32xf32, #tpu.memory_space<vmem>>, vector<16x32xf32>
    %c0_1 = arith.constant 0 : index
    %c0_2 = arith.constant 0 : index
    %1 = vector.load %arg4[%c0_1, %c0_2] : memref<8x32xf32, #tpu.memory_space<vmem>>, vector<8x32xf32>
    %c0_3 = arith.constant 0 : index
    %c0_4 = arith.constant 0 : index
    %c0_5 = arith.constant 0 : index
    %2 = vector.load %arg3[%c0_3, %c0_4, %c0_5] : memref<9x32x32xf32, #tpu.memory_space<vmem>>, vector<1x32x32xf32>
    %3 = vector.shape_cast %2 : vector<1x32x32xf32> to vector<32x32xf32>
    %c1 = arith.constant 1 : index
    %c0_6 = arith.constant 0 : index
    %c0_7 = arith.constant 0 : index
    %4 = vector.load %arg3[%c1, %c0_6, %c0_7] : memref<9x32x32xf32, #tpu.memory_space<vmem>>, vector<1x32x32xf32>
    %5 = vector.shape_cast %4 : vector<1x32x32xf32> to vector<32x32xf32>
    %c2 = arith.constant 2 : index
    %c0_8 = arith.constant 0 : index
    %c0_9 = arith.constant 0 : index
    %6 = vector.load %arg3[%c2, %c0_8, %c0_9] : memref<9x32x32xf32, #tpu.memory_space<vmem>>, vector<1x32x32xf32>
    %7 = vector.shape_cast %6 : vector<1x32x32xf32> to vector<32x32xf32>
    %c3 = arith.constant 3 : index
    %c0_10 = arith.constant 0 : index
    %c0_11 = arith.constant 0 : index
    %8 = vector.load %arg3[%c3, %c0_10, %c0_11] : memref<9x32x32xf32, #tpu.memory_space<vmem>>, vector<1x32x32xf32>
    %9 = vector.shape_cast %8 : vector<1x32x32xf32> to vector<32x32xf32>
    %c4 = arith.constant 4 : index
    %c0_12 = arith.constant 0 : index
    %c0_13 = arith.constant 0 : index
    %10 = vector.load %arg3[%c4, %c0_12, %c0_13] : memref<9x32x32xf32, #tpu.memory_space<vmem>>, vector<1x32x32xf32>
    %11 = vector.shape_cast %10 : vector<1x32x32xf32> to vector<32x32xf32>
    %c5 = arith.constant 5 : index
    %c0_14 = arith.constant 0 : index
    %c0_15 = arith.constant 0 : index
    %12 = vector.load %arg3[%c5, %c0_14, %c0_15] : memref<9x32x32xf32, #tpu.memory_space<vmem>>, vector<1x32x32xf32>
    %13 = vector.shape_cast %12 : vector<1x32x32xf32> to vector<32x32xf32>
    %c6 = arith.constant 6 : index
    %c0_16 = arith.constant 0 : index
    %c0_17 = arith.constant 0 : index
    %14 = vector.load %arg3[%c6, %c0_16, %c0_17] : memref<9x32x32xf32, #tpu.memory_space<vmem>>, vector<1x32x32xf32>
    %15 = vector.shape_cast %14 : vector<1x32x32xf32> to vector<32x32xf32>
    %c7 = arith.constant 7 : index
    %c0_18 = arith.constant 0 : index
    %c0_19 = arith.constant 0 : index
    %16 = vector.load %arg3[%c7, %c0_18, %c0_19] : memref<9x32x32xf32, #tpu.memory_space<vmem>>, vector<1x32x32xf32>
    %17 = vector.shape_cast %16 : vector<1x32x32xf32> to vector<32x32xf32>
    %c8 = arith.constant 8 : index
    %c0_20 = arith.constant 0 : index
    %c0_21 = arith.constant 0 : index
    %18 = vector.load %arg3[%c8, %c0_20, %c0_21] : memref<9x32x32xf32, #tpu.memory_space<vmem>>, vector<1x32x32xf32>
    %19 = vector.shape_cast %18 : vector<1x32x32xf32> to vector<32x32xf32>
    %20 = vector.extract_strided_slice %1 {offsets = [0, 0], sizes = [1, 32], strides = [1, 1]} : vector<8x32xf32> to vector<1x32xf32>
    %21 = vector.extract_strided_slice %1 {offsets = [1, 0], sizes = [1, 32], strides = [1, 1]} : vector<8x32xf32> to vector<1x32xf32>
    %22 = vector.extract_strided_slice %1 {offsets = [2, 0], sizes = [1, 32], strides = [1, 1]} : vector<8x32xf32> to vector<1x32xf32>
    %23 = vector.extract_strided_slice %1 {offsets = [3, 0], sizes = [1, 32], strides = [1, 1]} : vector<8x32xf32> to vector<1x32xf32>
    %24 = vector.extract_strided_slice %1 {offsets = [4, 0], sizes = [1, 32], strides = [1, 1]} : vector<8x32xf32> to vector<1x32xf32>
    %25 = vector.extract_strided_slice %1 {offsets = [5, 0], sizes = [1, 32], strides = [1, 1]} : vector<8x32xf32> to vector<1x32xf32>
    %26 = vector.extract_strided_slice %1 {offsets = [6, 0], sizes = [1, 32], strides = [1, 1]} : vector<8x32xf32> to vector<1x32xf32>
    %27 = vector.extract_strided_slice %1 {offsets = [7, 0], sizes = [1, 32], strides = [1, 1]} : vector<8x32xf32> to vector<1x32xf32>
    %cst = arith.constant dense<0.000000e+00> : vector<16x32xf32>
    %28 = tpu.matmul %0, %15, %cst {dimension_numbers = #tpu.dot_dimension_numbers<[1], [0], [0], [1], [0, 0, 1, 1], [], []>} : vector<16x32xf32>, vector<32x32xf32>, vector<16x32xf32> -> vector<16x32xf32>
    %29 = vector.broadcast %25 : vector<1x32xf32> to vector<16x32xf32>
    %30 = arith.addf %28, %29 : vector<16x32xf32>
    %cst_22 = arith.constant dense<0.000000e+00> : vector<16x32xf32>
    %31 = tpu.matmul %0, %17, %cst_22 {dimension_numbers = #tpu.dot_dimension_numbers<[1], [0], [0], [1], [0, 0, 1, 1], [], []>} : vector<16x32xf32>, vector<32x32xf32>, vector<16x32xf32> -> vector<16x32xf32>
    %32 = vector.broadcast %26 : vector<1x32xf32> to vector<16x32xf32>
    %33 = arith.addf %31, %32 : vector<16x32xf32>
    %cst_23 = arith.constant dense<0.000000e+00> : vector<16x32xf32>
    %34 = tpu.matmul %0, %19, %cst_23 {dimension_numbers = #tpu.dot_dimension_numbers<[1], [0], [0], [1], [0, 0, 1, 1], [], []>} : vector<16x32xf32>, vector<32x32xf32>, vector<16x32xf32> -> vector<16x32xf32>
    %35 = vector.broadcast %27 : vector<1x32xf32> to vector<16x32xf32>
    %36 = arith.addf %34, %35 : vector<16x32xf32>
    %cst_24 = arith.constant dense<0.000000e+00> : vector<16x32xf32>
    %37 = tpu.matmul %0, %3, %cst_24 {dimension_numbers = #tpu.dot_dimension_numbers<[1], [0], [0], [1], [0, 0, 1, 1], [], []>} : vector<16x32xf32>, vector<32x32xf32>, vector<16x32xf32> -> vector<16x32xf32>
    %38 = vector.broadcast %20 : vector<1x32xf32> to vector<16x32xf32>
    %39 = arith.addf %37, %38 : vector<16x32xf32>
    %cst_25 = arith.constant 0.000000e+00 : f32
    %40 = vector.broadcast %cst_25 : f32 to vector<16x32xf32>
    %41 = arith.maximumf %39, %40 : vector<16x32xf32>
    %cst_26 = arith.constant dense<0.000000e+00> : vector<16x32xf32>
    %42 = tpu.matmul %41, %5, %cst_26 {dimension_numbers = #tpu.dot_dimension_numbers<[1], [0], [0], [1], [0, 0, 1, 1], [], []>} : vector<16x32xf32>, vector<32x32xf32>, vector<16x32xf32> -> vector<16x32xf32>
    %43 = vector.broadcast %21 : vector<1x32xf32> to vector<16x32xf32>
    %44 = arith.addf %42, %43 : vector<16x32xf32>
    %cst_27 = arith.constant 0.000000e+00 : f32
    %45 = vector.broadcast %cst_27 : f32 to vector<16x32xf32>
    %46 = arith.maximumf %44, %45 : vector<16x32xf32>
    %c0_28 = arith.constant 0 : index
    %c0_29 = arith.constant 0 : index
    %c0_30 = arith.constant 0 : index
    %47 = vector.load %arg1[%c0_28, %c0_29, %c0_30] : memref<2x8x8xf32, #tpu.memory_space<vmem>>, vector<1x8x8xf32>
    %48 = vector.shape_cast %47 : vector<1x8x8xf32> to vector<8x8xf32>
    %49 = vector.extract_strided_slice %46 {offsets = [0, 0], sizes = [8, 32], strides = [1, 1]} : vector<16x32xf32> to vector<8x32xf32>
    %cst_31 = arith.constant dense<0.000000e+00> : vector<8x32xf32>
    %50 = tpu.matmul %48, %49, %cst_31 {dimension_numbers = #tpu.dot_dimension_numbers<[1], [0], [0], [1], [0, 0, 1, 1], [], []>} : vector<8x8xf32>, vector<8x32xf32>, vector<8x32xf32> -> vector<8x32xf32>
    %cst_32 = arith.constant 0.000000e+00 : f32
    %51 = vector.broadcast %cst_32 : f32 to vector<8x32xf32>
    %52 = arith.maximumf %50, %51 : vector<8x32xf32>
    %c1_33 = arith.constant 1 : index
    %c0_34 = arith.constant 0 : index
    %c0_35 = arith.constant 0 : index
    %53 = vector.load %arg1[%c1_33, %c0_34, %c0_35] : memref<2x8x8xf32, #tpu.memory_space<vmem>>, vector<1x8x8xf32>
    %54 = vector.shape_cast %53 : vector<1x8x8xf32> to vector<8x8xf32>
    %55 = vector.extract_strided_slice %46 {offsets = [8, 0], sizes = [8, 32], strides = [1, 1]} : vector<16x32xf32> to vector<8x32xf32>
    %cst_36 = arith.constant dense<0.000000e+00> : vector<8x32xf32>
    %56 = tpu.matmul %54, %55, %cst_36 {dimension_numbers = #tpu.dot_dimension_numbers<[1], [0], [0], [1], [0, 0, 1, 1], [], []>} : vector<8x8xf32>, vector<8x32xf32>, vector<8x32xf32> -> vector<8x32xf32>
    %cst_37 = arith.constant 0.000000e+00 : f32
    %57 = vector.broadcast %cst_37 : f32 to vector<8x32xf32>
    %58 = arith.maximumf %56, %57 : vector<8x32xf32>
    %59 = tpu.concatenate %52, %58 in 0 : vector<8x32xf32>, vector<8x32xf32> -> vector<16x32xf32>
    %cst_38 = arith.constant dense<0.000000e+00> : vector<16x32xf32>
    %60 = tpu.matmul %59, %9, %cst_38 {dimension_numbers = #tpu.dot_dimension_numbers<[1], [0], [0], [1], [0, 0, 1, 1], [], []>} : vector<16x32xf32>, vector<32x32xf32>, vector<16x32xf32> -> vector<16x32xf32>
    %61 = vector.broadcast %22 : vector<1x32xf32> to vector<16x32xf32>
    %62 = arith.addf %60, %61 : vector<16x32xf32>
    %cst_39 = arith.constant dense<0.000000e+00> : vector<16x32xf32>
    %63 = tpu.matmul %59, %11, %cst_39 {dimension_numbers = #tpu.dot_dimension_numbers<[1], [0], [0], [1], [0, 0, 1, 1], [], []>} : vector<16x32xf32>, vector<32x32xf32>, vector<16x32xf32> -> vector<16x32xf32>
    %64 = vector.broadcast %23 : vector<1x32xf32> to vector<16x32xf32>
    %65 = arith.addf %63, %64 : vector<16x32xf32>
    %cst_40 = arith.constant dense<0.000000e+00> : vector<16x32xf32>
    %66 = tpu.matmul %59, %13, %cst_40 {dimension_numbers = #tpu.dot_dimension_numbers<[1], [0], [0], [1], [0, 0, 1, 1], [], []>} : vector<16x32xf32>, vector<32x32xf32>, vector<16x32xf32> -> vector<16x32xf32>
    %67 = vector.broadcast %24 : vector<1x32xf32> to vector<16x32xf32>
    %68 = arith.addf %66, %67 : vector<16x32xf32>
    %69 = arith.addf %62, %30 : vector<16x32xf32>
    %70 = arith.negf %69 : vector<16x32xf32>
    %71 = math.exp %70 : vector<16x32xf32>
    %cst_41 = arith.constant 1.000000e+00 : f32
    %72 = vector.broadcast %cst_41 : f32 to vector<16x32xf32>
    %73 = arith.addf %72, %71 : vector<16x32xf32>
    %74 = arith.divf %72, %73 : vector<16x32xf32>
    %75 = arith.addf %65, %33 : vector<16x32xf32>
    %76 = arith.negf %75 : vector<16x32xf32>
    %77 = math.exp %76 : vector<16x32xf32>
    %cst_42 = arith.constant 1.000000e+00 : f32
    %78 = vector.broadcast %cst_42 : f32 to vector<16x32xf32>
    %79 = arith.addf %78, %77 : vector<16x32xf32>
    %80 = arith.divf %78, %79 : vector<16x32xf32>
    %81 = arith.mulf %74, %36 : vector<16x32xf32>
    %82 = arith.addf %68, %81 : vector<16x32xf32>
    %83 = math.tanh %82 : vector<16x32xf32>
    %cst_43 = arith.constant 1.000000e+00 : f32
    %84 = vector.broadcast %cst_43 : f32 to vector<16x32xf32>
    %85 = arith.subf %84, %80 : vector<16x32xf32>
    %86 = arith.mulf %85, %83 : vector<16x32xf32>
    %87 = arith.mulf %80, %0 : vector<16x32xf32>
    %88 = arith.addf %86, %87 : vector<16x32xf32>
    %c0_44 = arith.constant 0 : index
    %c0_45 = arith.constant 0 : index
    %89 = vector.load %arg5[%c0_44, %c0_45] : memref<16x32xf32, #tpu.memory_space<vmem>>, vector<16x32xf32>
    tpu.vector_store %arg5[%c0_44, %c0_45], %88 {strides = array<i32>} : memref<16x32xf32, #tpu.memory_space<vmem>>, vector<16x32xf32>,
    %cst_46 = arith.constant dense<0.000000e+00> : vector<16x32xf32>
    %90 = tpu.matmul %88, %7, %cst_46 {dimension_numbers = #tpu.dot_dimension_numbers<[1], [0], [0], [1], [0, 0, 1, 1], [], []>} : vector<16x32xf32>, vector<32x32xf32>, vector<16x32xf32> -> vector<16x32xf32>
    %91 = vector.extract_strided_slice %88 {offsets = [0, 0], sizes = [8, 32], strides = [1, 1]} : vector<16x32xf32> to vector<8x32xf32>
    %92 = vector.extract_strided_slice %90 {offsets = [0, 0], sizes = [8, 32], strides = [1, 1]} : vector<16x32xf32> to vector<8x32xf32>
    %cst_47 = arith.constant dense<0.000000e+00> : vector<8x8xf32>
    %93 = tpu.matmul %92, %91, %cst_47 {dimension_numbers = #tpu.dot_dimension_numbers<[1], [1], [0], [0], [0, 0, 1, 0], [], []>} : vector<8x32xf32>, vector<8x32xf32>, vector<8x8xf32> -> vector<8x8xf32>
    %94 = arith.negf %93 : vector<8x8xf32>
    %95 = math.exp %94 : vector<8x8xf32>
    %cst_48 = arith.constant 1.000000e+00 : f32
    %96 = vector.broadcast %cst_48 : f32 to vector<8x8xf32>
    %97 = arith.addf %96, %95 : vector<8x8xf32>
    %98 = arith.divf %96, %97 : vector<8x8xf32>
    %c0_49 = arith.constant 0 : index
    %c0_50 = arith.constant 0 : index
    %c0_51 = arith.constant 0 : index
    %99 = vector.load %arg2[%c0_49, %c0_50, %c0_51] : memref<2x8x8xf32, #tpu.memory_space<vmem>>, vector<1x8x8xf32>
    %100 = vector.shape_cast %99 : vector<1x8x8xf32> to vector<8x8xf32>
    %101 = arith.mulf %98, %100 : vector<8x8xf32>
    %102 = vector.extract_strided_slice %88 {offsets = [8, 0], sizes = [8, 32], strides = [1, 1]} : vector<16x32xf32> to vector<8x32xf32>
    %103 = vector.extract_strided_slice %90 {offsets = [8, 0], sizes = [8, 32], strides = [1, 1]} : vector<16x32xf32> to vector<8x32xf32>
    %cst_52 = arith.constant dense<0.000000e+00> : vector<8x8xf32>
    %104 = tpu.matmul %103, %102, %cst_52 {dimension_numbers = #tpu.dot_dimension_numbers<[1], [1], [0], [0], [0, 0, 1, 0], [], []>} : vector<8x32xf32>, vector<8x32xf32>, vector<8x8xf32> -> vector<8x8xf32>
    %105 = arith.negf %104 : vector<8x8xf32>
    %106 = math.exp %105 : vector<8x8xf32>
    %cst_53 = arith.constant 1.000000e+00 : f32
    %107 = vector.broadcast %cst_53 : f32 to vector<8x8xf32>
    %108 = arith.addf %107, %106 : vector<8x8xf32>
    %109 = arith.divf %107, %108 : vector<8x8xf32>
    %c1_54 = arith.constant 1 : index
    %c0_55 = arith.constant 0 : index
    %c0_56 = arith.constant 0 : index
    %110 = vector.load %arg2[%c1_54, %c0_55, %c0_56] : memref<2x8x8xf32, #tpu.memory_space<vmem>>, vector<1x8x8xf32>
    %111 = vector.shape_cast %110 : vector<1x8x8xf32> to vector<8x8xf32>
    %112 = arith.mulf %109, %111 : vector<8x8xf32>
    %113 = vector.shape_cast %101 : vector<8x8xf32> to vector<1x8x8xf32>
    %114 = vector.shape_cast %112 : vector<8x8xf32> to vector<1x8x8xf32>
    %115 = tpu.concatenate %113, %114 in 0 : vector<1x8x8xf32>, vector<1x8x8xf32> -> vector<2x8x8xf32>
    %c0_57 = arith.constant 0 : index
    %c0_58 = arith.constant 0 : index
    %c0_59 = arith.constant 0 : index
    %116 = vector.load %arg6[%c0_57, %c0_58, %c0_59] : memref<2x8x8xf32, #tpu.memory_space<vmem>>, vector<2x8x8xf32>
    tpu.vector_store %arg6[%c0_57, %c0_58, %c0_59], %115 {strides = array<i32>} : memref<2x8x8xf32, #tpu.memory_space<vmem>>, vector<2x8x8xf32>,
    return
  }
}

</mosaic_0001>

<bundles_post_ra>
// kernel: tpu_custom_call.1
= control target key start
LH: loop header
LB: loop body
LE: loop exit
PB: predicated region body
PF: predicated region fallthrough
CT: control target
= control target key end

     0   :  { %12 = vsyncpa [#allocation3], 0  ;;  %s1846_s0 = inlined_call_operand.hbm [shape: f32[16,32], index: 0, kind: input, shape index: {}]   ;;  %s1847_s1 = inlined_call_operand.hbm [shape: f32[2,8,8], index: 1, kind: input, shape index: {}]   ;;  %s1848_s2 = inlined_call_operand.hbm [shape: f32[2,8,8], index: 2, kind: input, shape index: {}]   ;;  %s1849_s3 = inlined_call_operand.hbm [shape: f32[9,32,32], index: 3, kind: input, shape index: {}]   ;;  %s1850_s4 = inlined_call_operand.hbm [shape: f32[8,32], index: 4, kind: input, shape index: {}]   ;;  %s1851_s5 = inlined_call_operand.hbm [shape: f32[16,32], index: 5, kind: output, shape index: {0}]   ;;  %s1852_s6 = inlined_call_operand.hbm [shape: f32[2,8,8], index: 6, kind: output, shape index: {1}]  }
   0x1   :  { %13 = vsyncpa [#allocation6], 0 }
   0x2   :  { %14 = vsyncpa [#allocation9], 0 }
   0x3   :  { %15 = vsyncpa [#allocation4], 0 }
   0x4   :  { %16 = vsyncpa [#allocation13], 0  ;;  %s1669_s21 = smov [#allocation5]   ;;  %s1670_s23 = smov [#allocation8]  }
   0x5   :  { %s34_s22 = sshll.u32 %s1669_s21, 4  ;;  %s58_s24 = sshll.u32 %s1670_s23, 4  ;;  %s35_s22 = int_to_ptr.vmem [resolvable:$true] %s34_s22  ;;  %s59_s24 = int_to_ptr.vmem [resolvable:$true] %s58_s24 }
   0x6   :  { %s1527_s25 = scalar_lea.vmem %s35_s22, 256  ;;  %p1532_p1 = scmp.lt.s32.totalorder %s35_s22, %s35_s22 }
   0x7   :  { %p1528_p0 = scmp.ne.s32.totalorder %s35_s22, %s1527_s25  ;;  %p1533_p2 = scmp.lt.s32.totalorder %s1527_s25, %s1527_s25 }
   0x9   :  { %p1534_p3 = por %p1533_p2, %p1532_p1 }
   0xb   :  { %p1535_p4 = pnand %p1534_p3, %p1528_p0 }
   0xd   :  { %1538 = shalt.err (!%p1535_p4)
}
   0xe   :  { %s1671_s26 = smov 128   ;;  %s1672_s27 = smov 8  }
   0xf   :  { %40 = dma.hbm_to_vmem [thread:$0]  %s1847_s1, 256, %s35_s22, [#allocation6], %s1671_s26, %s1671_s26, %s1672_s27  }
  0x10   :  { %s1547_s30 = scalar_lea.vmem %s59_s24, 4608  ;;  %p1552_p6 = scmp.lt.s32.totalorder %s59_s24, %s59_s24 }
  0x11   :  { %p1548_p5 = scmp.ne.s32.totalorder %s59_s24, %s1547_s30  ;;  %p1553_p7 = scmp.lt.s32.totalorder %s1547_s30, %s1547_s30 }
  0x13   :  { %p1554_p8 = por %p1553_p7, %p1552_p6 }
  0x15   :  { %p1555_p9 = pnand %p1554_p8, %p1548_p5 }
  0x17   :  { %1558 = shalt.err (!%p1555_p9)
}
  0x18   :  { %64 = dma.hbm_to_vmem [thread:$0]  %s1849_s3, 4608, %s59_s24, [#allocation9], %s1671_s26, %s1671_s26, %s1672_s27  }
  0x19   :  { %s1673_s9 = smov [#allocation2]   ;;  %s1674_s11 = smov [#allocation7]  }
  0x1a   :  { %s22_s10 = sshll.u32 %s1673_s9, 4  ;;  %s46_s12 = sshll.u32 %s1674_s11, 4  ;;  %s23_s10 = int_to_ptr.vmem [resolvable:$true] %s22_s10  ;;  %s47_s12 = int_to_ptr.vmem [resolvable:$true] %s46_s12 }
  0x1b   :  { %s1567_s1 = scalar_lea.vmem %s23_s10, 256  ;;  %p1572_p11 = scmp.lt.s32.totalorder %s23_s10, %s23_s10 }
  0x1c   :  { %p1568_p10 = scmp.ne.s32.totalorder %s23_s10, %s1567_s1  ;;  %p1573_p12 = scmp.lt.s32.totalorder %s1567_s1, %s1567_s1 }
  0x1e   :  { %p1574_p13 = por %p1573_p12, %p1572_p11 }
  0x20   :  { %p1575_p0 = pnand %p1574_p13, %p1568_p10 }
  0x22   :  { %1578 = shalt.err (!%p1575_p0)
}
  0x23   :  { %28 = dma.hbm_to_vmem [thread:$0]  %s1846_s0, 256, %s23_s10, [#allocation3], %s1671_s26, %s1671_s26, %s1672_s27  }
  0x24   :  { %s1587_s3 = scalar_lea.vmem %s47_s12, 256  ;;  %p1592_p2 = scmp.lt.s32.totalorder %s47_s12, %s47_s12 }
  0x25   :  { %p1588_p1 = scmp.ne.s32.totalorder %s47_s12, %s1587_s3  ;;  %p1593_p3 = scmp.lt.s32.totalorder %s1587_s3, %s1587_s3 }
  0x27   :  { %p1594_p4 = por %p1593_p3, %p1592_p2 }
  0x29   :  { %p1595_p5 = pnand %p1594_p4, %p1588_p1 }
  0x2b   :  { %1598 = shalt.err (!%p1595_p5)
}
  0x2c   :  { %52 = dma.hbm_to_vmem [thread:$0]  %s1848_s2, 256, %s47_s12, [#allocation6], %s1671_s26, %s1671_s26, %s1672_s27  }
  0x2d   :  { %s1675_s17 = smov [#allocation10]  }
  0x2e   :  { %s71_s18 = sshll.u32 %s1675_s17, 4  ;;  %s72_s18 = int_to_ptr.vmem [resolvable:$true] %s71_s18 }
  0x2f   :  { %s1607_s19 = scalar_lea.vmem %s72_s18, 128  ;;  %p1612_p7 = scmp.lt.s32.totalorder %s72_s18, %s72_s18 }
  0x30   :  { %p1608_p6 = scmp.ne.s32.totalorder %s72_s18, %s1607_s19  ;;  %p1613_p8 = scmp.lt.s32.totalorder %s1607_s19, %s1607_s19 }
  0x32   :  { %p1614_p9 = por %p1613_p8, %p1612_p7 }
  0x34   :  { %p1615_p10 = pnand %p1614_p9, %p1608_p6 }
  0x36   :  { %1618 = shalt.err (!%p1615_p10)
}
  0x37   :  { %74 = dma.hbm_to_vmem [thread:$0]  %s1850_s4, 128, %s72_s18, [#allocation9]  }
  0x38   :  { %1659 = dma.done.wait [#allocation3], 256  }
  0x39   :  { %1660 = vsyncadd [#allocation3], 4294967040 }
  0x3a   :  { %1661 = dma.done.wait [#allocation6], 512  }
  0x3b   :  { %1662 = vsyncadd [#allocation6], 4294966784 }
  0x3c   :  { %1663 = dma.done.wait [#allocation9], 4736  }
  0x3d   :  { %1664 = vsyncadd [#allocation9], 4294962560  ;;  %vm141_vm0 = vcmask 261120   ;;  %v131_v0 = vld [vmem:[#allocation8 + $0xf8] sm:$0xff]  ;;  %v130_v1 = vld [vmem:[#allocation8 + $0xf0] sm:$0xff]  ;;  %v137_v22 = vlaneseq  ;;  %v1676_v35 = vmov 0.0  }
  0x3e   :  { %1372 = vmatprep.subr.mxu1 %v131_v0  ;;  %v1742_v2 = vld [vmem:[#allocation2] sm:$0xff]  ;;  %v129_v3 = vld [vmem:[#allocation8 + $0xe8] sm:$0xff]  ;;  %v126_v4 = vld [vmem:[#allocation8 + $0xd8] sm:$0xff]  ;;  %vm1677_vm1 = vmmov 0   ;;  %vm550_vm2 = vcmask 64512   ;;  %s1678_s2 = smov [#allocation11]  }
  0x3f   :  { %1373 = vmatpush3.msra.mxu1 %v131_v0  ;;  %1380 = vmatprep.mubr.msk.f32.mxu1 %vm141_vm0, %v1742_v2  ;;  %v125_v5 = vld [vmem:[#allocation8 + $0xd0] sm:$0xff]  ;;  %v128_v6 = vld [vmem:[#allocation8 + $0xe0] sm:$0xff]  ;;  %v124_v7 = vld [vmem:[#allocation8 + $0xc8] sm:$0xff]  ;;  %v1762_v23 = vshrl.u32 %v137_v22, 7  ;;  %s1239_s4 = sshll.u32 %s1678_s2, 4  ;;  %s1240_s4 = int_to_ptr.vmem [resolvable:$true] %s1239_s4 }
  0x40   :  { %1374 = vmatprep.subr.mxu1 %v130_v1  ;;  %1369 = vmatprep.mubr.msk.f32.mxu0 %vm141_vm0, %v1742_v2  ;;  %v1748_v8 = vld [vmem:[#allocation2 + $0x8] sm:$0xff]  ;;  %v95_v10 = vld [vmem:[#allocation8 + $0x10] sm:$0xff]  ;;  %v123_v11 = vld [vmem:[#allocation8 + $0xc0] sm:$0xff]  ;;  %s1619_s21 = scalar_lea.vmem %s1240_s4, 256  ;;  %p1624_p12 = scmp.lt.s32.totalorder %s1240_s4, %s1240_s4 }
  0x41   :  { %1375 = vmatpush3.msra.mxu1 %v130_v1  ;;  %1361 = vmatprep.subr.mxu0 %v126_v4  ;;  %v96_v9 = vld [vmem:[#allocation8 + $0x18] sm:$0xff]  ;;  %v94_v12 = vld [vmem:[#allocation8 + $0x8] sm:$0xff]  ;;  %v93_v13 = vld [vmem:[#allocation8] sm:$0xff]  ;;  %v383_v25 = vsub.s32 0, %v1762_v23  ;;  %v464_v40 = vsub.s32 1, %v1762_v23  ;;  %p1620_p11 = scmp.ne.s32.totalorder %s1240_s4, %s1619_s21  ;;  %p1625_p13 = scmp.lt.s32.totalorder %s1619_s21, %s1619_s21 }
  0x42   :  { %1376 = vmatprep.subr.mxu1 %v129_v3  ;;  %1362 = vmatpush3.msra.mxu0 %v126_v4  ;;  %v136_v14 = vld [vmem:[#allocation8 + $0x118] sm:$0xff]  ;;  %v135_v15 = vld [vmem:[#allocation8 + $0x110] sm:$0xff]  ;;  %v134_v16 = vld [vmem:[#allocation8 + $0x108] sm:$0xff] }
  0x43   :  { %1377 = vmatpush3.msra.mxu1 %v129_v3  ;;  %1363 = vmatprep.subr.mxu0 %v125_v5  ;;  %v133_v17 = vld [vmem:[#allocation8 + $0x100] sm:$0xff]  ;;  %v101_v18 = vld [vmem:[#allocation8 + $0x38] sm:$0xff]  ;;  %v100_v19 = vld [vmem:[#allocation8 + $0x30] sm:$0xff]  ;;  %p1626_p0 = por %p1625_p13, %p1624_p12 }
  0x44   :  { %1378 = vmatprep.subr.mxu1 %v128_v6  ;;  %1364 = vmatpush3.msra.mxu0 %v125_v5  ;;  %v99_v20 = vld [vmem:[#allocation8 + $0x28] sm:$0xff]  ;;  %v98_v21 = vld [vmem:[#allocation8 + $0x20] sm:$0xff]  ;;  %v111_v36 = vld [vmem:[#allocation8 + $0x78] sm:$0xff] }
  0x45   :  { %1379 = vmatpush3.msra.mxu1 %v128_v6  ;;  %1365 = vmatprep.subr.mxu0 %v124_v7  ;;  %v1767_v26 = vld [vmem:[#allocation10] sm:$0xff]  ;;  %v116_v50 = vld [vmem:[#allocation8 + $0x98] sm:$0xff]  ;;  %v626_v51 = vld [vmem:[#allocation5 + $0x8] sm:$0xff]  ;;  %p1627_p1 = pnand %p1626_p0, %p1620_p11 }
  0x46   :  { %1381 = vmatmul.mubr.msk.f32.vlgmr.msra.gmra.mxu1 %vm141_vm0, %v1748_v8  ;;  %1394 = vmatprep.subr.mxu1 %v96_v9  ;;  %v384_v28 = vrot.slane %v1767_v26, %v383_v25  ;;  %v465_v42 = vrot.slane %v1767_v26, %v464_v40  ;;  %v549_v48 = vld [vmem:[#allocation5] sm:$0xff]  ;;  %v110_v52 = vld [vmem:[#allocation8 + $0x70] sm:$0xff]  ;;  %v109_v54 = vld [vmem:[#allocation8 + $0x68] sm:$0xff] }
  0x47   :  { %1395 = vmatpush3.msra.mxu1 %v96_v9  ;;  %1402 = vmatprep.mubr.msk.f32.mxu1 %vm141_vm0, %v1742_v2  ;;  %v115_v53 = vld [vmem:[#allocation8 + $0x90] sm:$0xff]  ;;  %v114_v55 = vld [vmem:[#allocation8 + $0x88] sm:$0xff]  ;;  %v108_v56 = vld [vmem:[#allocation8 + $0x60] sm:$0xff] }
  0x48   :  { %1396 = vmatprep.subr.mxu1 %v95_v10  ;;  %1366 = vmatpush3.msra.mxu0 %v124_v7  ;;  %v113_v57 = vld [vmem:[#allocation8 + $0x80] sm:$0xff]  ;;  %v121_v58 = vld [vmem:[#allocation8 + $0xb8] sm:$0xff]  ;;  %v120_v1 = vld [vmem:[#allocation8 + $0xb0] sm:$0xff] }
  0x49   :  { %1397 = vmatpush3.msra.mxu1 %v95_v10  ;;  %1367 = vmatprep.subr.mxu0 %v123_v11  ;;  %v119_v3 = vld [vmem:[#allocation8 + $0xa8] sm:$0xff]  ;;  %v118_v4 = vld [vmem:[#allocation8 + $0xa0] sm:$0xff]  ;;  %v106_v5 = vld [vmem:[#allocation8 + $0x58] sm:$0xff]  ;;  %v139_v10 = vsub.s32 5, %v1762_v23 }
  0x4a   :  { %1398 = vmatprep.subr.mxu1 %v94_v12  ;;  %1368 = vmatpush3.msra.mxu0 %v123_v11  ;;  %v105_v6 = vld [vmem:[#allocation8 + $0x50] sm:$0xff]  ;;  %v104_v7 = vld [vmem:[#allocation8 + $0x48] sm:$0xff]  ;;  %v103_v9 = vld [vmem:[#allocation8 + $0x40] sm:$0xff]  ;;  %v703_v11 = vsub.s32 2, %v1762_v23 }
  0x4b   :  { %1399 = vmatpush3.msra.mxu1 %v94_v12  ;;  %1370 = vmatmul.mubr.msk.f32.vlgmr.msra.gmra.mxu0 %vm141_vm0, %v1748_v8  ;;  %v140_v12 = vrot.slane %v1767_v26, %v139_v10 }
  0x4c   :  { %1400 = vmatprep.subr.mxu1 %v93_v13  ;;  %1383 = vmatprep.subr.mxu0 %v136_v14 }
  0x4d   :  { %1401 = vmatpush3.msra.mxu1 %v93_v13  ;;  %1384 = vmatpush3.msra.mxu0 %v136_v14  ;;  %v704_v13 = vrot.slane %v1767_v26, %v703_v11  ;;  %v788_v14 = vsub.s32 3, %v1762_v23 }
  0x4e   :  { %1403 = vmatmul.mubr.msk.f32.vlgmr.msra.gmra.mxu1 %vm141_vm0, %v1748_v8  ;;  %1391 = vmatprep.mubr.msk.f32.mxu0 %vm141_vm0, %v1742_v2 }
  0x4f   :  { %1385 = vmatprep.subr.mxu0 %v135_v15  ;;  %1416 = vmatprep.subr.mxu1 %v1676_v35 }
  0x50   :  { %1386 = vmatpush3.msra.mxu0 %v135_v15  ;;  %1418 = vmatprep.mubr.msk.f32.mxu1 %vm1677_vm1, %v1676_v35  ;;  %v225_v15 = vsub.s32 6, %v1762_v23 }
  0x51   :  { %1387 = vmatprep.subr.mxu0 %v134_v16 }
  0x52   :  { %1388 = vmatpush3.msra.mxu0 %v134_v16  ;;  %v226_v22 = vrot.slane %v1767_v26, %v225_v15 }
  0x53   :  { %1389 = vmatprep.subr.mxu0 %v133_v17 }
  0x54   :  { %1390 = vmatpush3.msra.mxu0 %v133_v17 }
  0x55   :  { %1392 = vmatmul.mubr.msk.f32.vlgmr.msra.gmra.mxu0 %vm141_vm0, %v1748_v8  ;;  %1405 = vmatprep.subr.mxu0 %v101_v18 }
  0x56   :  { %1406 = vmatpush3.msra.mxu0 %v101_v18 }
  0x57   :  { %1407 = vmatprep.subr.mxu0 %v100_v19 }
  0x58   :  { %1408 = vmatpush3.msra.mxu0 %v100_v19 }
  0x59   :  { %1409 = vmatprep.subr.mxu0 %v99_v20 }
  0x5a   :  { %1410 = vmatpush3.msra.mxu0 %v99_v20  ;;  %v789_v20 = vrot.slane %v1767_v26, %v788_v14 }
  0x5b   :  { %1411 = vmatprep.subr.mxu0 %v98_v21 }
  0x5c   :  { %1412 = vmatpush3.msra.mxu0 %v98_v21 }
  0x5d   :  { %1426 = vmatprep.subr.mxu0 %v111_v36 }
 0x106   :  { %v1764_v24 = vpop.f32.mrf.mxu1 }
 0x108   :  { %v1769_v27 = vpop.f32.mrf.mxu1 }
 0x10b   :  { %v1777_v37 = vpop.f32.mrf.mxu0 }
 0x10c   :  { %v220_v18 = vadd.f32 %v1777_v37, %v140_v12  ;;  %v294_v37 = vadd.f32 %v1769_v27, %v226_v22 }
 0x10d   :  { %v1779_v38 = vpop.f32.mrf.mxu0 }
 0x10e   :  { %v1404_v29 = vpop.f32.mrf.mxu1  ;;  %v215_v25 = vadd.f32 %v1779_v38, %v140_v12 }
 0x10f   :  { %v457_v30 = vadd.f32 %v1404_v29, %v384_v28 }
 0x110   :  { %v451_v31 = vpop.f32.mrf.mxu1 }
 0x111   :  { %v452_v32 = vadd.f32 %v451_v31, %v384_v28  ;;  %v461_v34 = vmax.f32 %v457_v30, 0.0 }
 0x113   :  { %v460_v33 = vmax.f32 %v452_v32, 0.0 }
 0x115   :  { %1413 = vmatprep.mubr.msk.f32.mxu0 %vm141_vm0, %v460_v33  ;;  %v1781_v39 = vpop.f32.mrf.mxu0 }
 0x116   :  { %1414 = vmatmul.mubr.msk.f32.vlgmr.msra.gmra.mxu0 %vm141_vm0, %v461_v34  ;;  %v299_v34 = vadd.f32 %v1764_v24, %v226_v22  ;;  %v304_v24 = vsub.s32 7, %v1762_v23 }
 0x117   :  { %1427 = vmatpush3.msra.mxu0 %v111_v36  ;;  %v1784_v41 = vpop.f32.mrf.mxu0 }
 0x118   :  { %1428 = vmatprep.subr.mxu0 %v110_v52  ;;  %v305_v27 = vrot.slane %v1767_v26, %v304_v24 }
 0x119   :  { %1429 = vmatpush3.msra.mxu0 %v110_v52 }
 0x11a   :  { %1430 = vmatprep.subr.mxu0 %v109_v54 }
 0x11b   :  { %1431 = vmatpush3.msra.mxu0 %v109_v54 }
 0x11c   :  { %1432 = vmatprep.subr.mxu0 %v108_v56 }
 0x11d   :  { %1433 = vmatpush3.msra.mxu0 %v108_v56 }
 0x11e   :  { %1448 = vmatprep.subr.mxu0 %v121_v58 }
 0x1d6   :  { %v1415_v43 = vpop.f32.mrf.mxu0 }
 0x1d7   :  { %v544_v45 = vadd.f32 %v1415_v43, %v465_v42 }
 0x1d8   :  { %v538_v44 = vpop.f32.mrf.mxu0 }
 0x1d9   :  { %v539_v46 = vadd.f32 %v538_v44, %v465_v42  ;;  %v548_v49 = vmax.f32 %v544_v45, 0.0 }
 0x1db   :  { %v547_v47 = vmax.f32 %v539_v46, 0.0 }
 0x1dd   :  { %1417 = vmatpush3.msra.mxu1 %v547_v47 }
 0x1de   :  { %1419 = vmatmul.mubr.msk.f32.vlgmr.msra.gmra.mxu1 %vm550_vm2, %v549_v48  ;;  %1421 = vmatprep.subr.mxu1 %v1676_v35 }
 0x1df   :  { %1422 = vmatpush3.msra.mxu1 %v548_v49  ;;  %1423 = vmatprep.mubr.msk.f32.mxu1 %vm1677_vm1, %v1676_v35  ;;  %v867_v49 = vsub.s32 4, %v1762_v23 }
 0x1e0   :  { %1437 = vmatprep.subr.mxu1 %v116_v50 }
 0x1e1   :  { %v868_v54 = vrot.slane %v1767_v26, %v867_v49 }
 0x1e2   :  { %1424 = vmatmul.mubr.msk.f32.vlgmr.msra.gmra.mxu1 %vm550_vm2, %v626_v51 }
 0x1e3   :  { %1438 = vmatpush3.msra.mxu1 %v116_v50 }
 0x1e4   :  { %1439 = vmatprep.subr.mxu1 %v115_v53 }
 0x1e5   :  { %1440 = vmatpush3.msra.mxu1 %v115_v53 }
 0x1e6   :  { %1441 = vmatprep.subr.mxu1 %v114_v55 }
 0x1e7   :  { %1442 = vmatpush3.msra.mxu1 %v114_v55  ;;  %v378_v55 = vadd.f32 %v1781_v39, %v305_v27 }
 0x1e8   :  { %1443 = vmatprep.subr.mxu1 %v113_v57 }
 0x1e9   :  { %1444 = vmatpush3.msra.mxu1 %v113_v57 }
 0x1ea   :  { %1459 = vmatprep.subr.mxu1 %v106_v5 }
 0x29e   :  { %v620_v59 = vpop.f32.mrf.mxu1 }
 0x29f   :  { %v624_v60 = vmax.f32 %v620_v59, 0.0  ;;  %v373_v59 = vadd.f32 %v1784_v41, %v305_v27 }
 0x2a0   :  { %v1420_v61 = vpop.f32.mrf.mxu1 }
 0x2a1   :  { %1434 = vmatprep.mubr.msk.f32.mxu0 %vm141_vm0, %v624_v60  ;;  %1445 = vmatprep.mubr.msk.f32.mxu1 %vm141_vm0, %v624_v60 }
 0x2a2   :  { %v696_v62 = vpop.f32.mrf.mxu1 }
 0x2a3   :  { %v700_v63 = vmax.f32 %v696_v62, 0.0 }
 0x2a4   :  { %v1425_v0 = vpop.f32.mrf.mxu1 }
 0x2a5   :  { %1435 = vmatmul.mubr.msk.f32.vlgmr.msra.gmra.mxu0 %vm141_vm0, %v700_v63  ;;  %1446 = vmatmul.mubr.msk.f32.vlgmr.msra.gmra.mxu1 %vm141_vm0, %v700_v63 }
 0x2a6   :  { %1449 = vmatpush3.msra.mxu0 %v121_v58  ;;  %1456 = vmatprep.mubr.msk.f32.mxu0 %vm141_vm0, %v624_v60 }
 0x2a7   :  { %1450 = vmatprep.subr.mxu0 %v120_v1  ;;  %1460 = vmatpush3.msra.mxu1 %v106_v5 }
 0x2a8   :  { %1451 = vmatpush3.msra.mxu0 %v120_v1  ;;  %1461 = vmatprep.subr.mxu1 %v105_v6 }
 0x2a9   :  { %1452 = vmatprep.subr.mxu0 %v119_v3  ;;  %1462 = vmatpush3.msra.mxu1 %v105_v6 }
 0x2aa   :  { %1453 = vmatpush3.msra.mxu0 %v119_v3  ;;  %1463 = vmatprep.subr.mxu1 %v104_v7 }
 0x2ab   :  { %1454 = vmatprep.subr.mxu0 %v118_v4  ;;  %1464 = vmatpush3.msra.mxu1 %v104_v7 }
 0x2ac   :  { %1455 = vmatpush3.msra.mxu0 %v118_v4  ;;  %1465 = vmatprep.subr.mxu1 %v103_v9 }
 0x2ad   :  { %1457 = vmatmul.mubr.msk.f32.vlgmr.msra.gmra.mxu0 %vm141_vm0, %v700_v63  ;;  %1470 = vmatprep.subr.mxu0 %v1676_v35 }
 0x2ae   :  { %1472 = vmatprep.mubr.msk.f32.mxu0 %vm1677_vm1, %v1676_v35  ;;  %1466 = vmatpush3.msra.mxu1 %v103_v9 }
 0x2af   :  { %1475 = vmatprep.subr.mxu1 %v1676_v35 }
 0x365   :  { %v1436_v16 = vpop.f32.mrf.mxu0  ;;  %v1447_v17 = vpop.f32.mrf.mxu1 }
 0x366   :  { %v783_v19 = vadd.f32 %v1436_v16, %v704_v13  ;;  %v862_v32 = vadd.f32 %v1447_v17, %v789_v20 }
 0x367   :  { %v777_v21 = vpop.f32.mrf.mxu0  ;;  %v856_v30 = vpop.f32.mrf.mxu1 }
 0x368   :  { %v945_v28 = vadd.f32 %v783_v19, %v220_v18  ;;  %v778_v29 = vadd.f32 %v777_v21, %v704_v13  ;;  %v857_v40 = vadd.f32 %v856_v30, %v789_v20  ;;  %v959_v42 = vadd.f32 %v862_v32, %v299_v34 }
 0x36a   :  { %v1288_v31 = vmul.f32 -1.442695, %v945_v28  ;;  %v944_v33 = vadd.f32 %v778_v29, %v215_v25  ;;  %v958_v43 = vadd.f32 %v857_v40, %v294_v37  ;;  %v1290_v44 = vmul.f32 -1.442695, %v959_v42 }
 0x36c   :  { %1491 = vpow2.f32 %v1288_v31  ;;  %v1287_v36 = vmul.f32 -1.442695, %v944_v33  ;;  %v1289_v45 = vmul.f32 -1.442695, %v958_v43 }
 0x36d   :  { %v1458_v52 = vpop.f32.mrf.mxu0 }
 0x36e   :  { %1493 = vpow2.f32 %v1287_v36  ;;  %v941_v60 = vadd.f32 %v1458_v52, %v868_v54 }
 0x36f   :  { %1495 = vpow2.f32 %v1290_v44  ;;  %v935_v58 = vpop.f32.mrf.mxu0 }
 0x370   :  { %1497 = vpow2.f32 %v1289_v45  ;;  %v936_v63 = vadd.f32 %v935_v58, %v868_v54 }
 0x379   :  { %v1492_v38 = vpop.eup %1491 }
 0x37a   :  { %v953_v46 = vadd.f32 1.0, %v1492_v38 }
 0x37b   :  { %v1494_v47 = vpop.eup %1493 }
 0x37c   :  { %1499 = vrcp.f32 %v953_v46  ;;  %v952_v48 = vadd.f32 1.0, %v1494_v47  ;;  %v1496_v50 = vpop.eup %1495 }
 0x37d   :  { %v1498_v51 = vpop.eup %1497  ;;  %v967_v53 = vadd.f32 1.0, %v1496_v50 }
 0x37e   :  { %1501 = vrcp.f32 %v952_v48  ;;  %v966_v56 = vadd.f32 1.0, %v1498_v51 }
 0x37f   :  { %1503 = vrcp.f32 %v967_v53 }
 0x380   :  { %1505 = vrcp.f32 %v966_v56 }
 0x389   :  { %v1500_v57 = vpop.eup %1499 }
 0x38a   :  { %v973_v61 = vmul.f32 %v1500_v57, %v378_v55 }
 0x38b   :  { %v1502_v62 = vpop.eup %1501 }
 0x38c   :  { %v975_v23 = vadd.f32 %v973_v61, %v941_v60  ;;  %v972_v0 = vmul.f32 %v1502_v62, %v373_v59  ;;  %v1504_v3 = vpop.eup %1503 }
 0x38d   :  { %v1506_v26 = vpop.eup %1505  ;;  %v979_v4 = vsub.f32 1.0, %v1504_v3  ;;  %v983_v7 = vmul.f32 %v1504_v3, %v1748_v8 }
 0x38e   :  { %1507 = vtanh.f32 %v975_v23  ;;  %v974_v1 = vadd.f32 %v972_v0, %v936_v63  ;;  %v978_v5 = vsub.f32 1.0, %v1506_v26  ;;  %v982_v10 = vmul.f32 %v1506_v26, %v1742_v2 }
 0x390   :  { %1509 = vtanh.f32 %v974_v1 }
 0x39b   :  { %v1508_v39 = vpop.eup %1507 }
 0x39c   :  { %v981_v6 = vmul.f32 %v1508_v39, %v979_v4 }
 0x39d   :  { %v1510_v41 = vpop.eup %1509 }
 0x39e   :  { %v980_v9 = vmul.f32 %v1510_v41, %v978_v5  ;;  %v985_v11 = vadd.f32 %v983_v7, %v981_v6 }
 0x3a0   :  { %v984_v12 = vadd.f32 %v982_v10, %v980_v9  ;;  %987 = vst.msk [vmem:[#allocation11 + $0x8] sm:$0xff] %vm141_vm0, %v985_v11 }
 0x3a2   :  { %1467 = vmatprep.mubr.msk.f32.mxu1 %vm141_vm0, %v984_v12  ;;  %986 = vst.msk [vmem:[#allocation11] sm:$0xff] %vm141_vm0, %v984_v12  ;;  %1471 = vmatpush3.xpose.msk.msra.mxu0 %vm141_vm0, %v984_v12 }
 0x3a3   :  { %1468 = vmatmul.mubr.msk.f32.vlgmr.msra.gmra.mxu1 %vm141_vm0, %v985_v11 }
 0x3a4   :  { %1476 = vmatpush3.xpose.msk.msra.mxu1 %vm141_vm0, %v985_v11  ;;  %1477 = vmatprep.mubr.msk.f32.mxu1 %vm1677_vm1, %v1676_v35 }
 0x463   :  { %v1469_v8 = vpop.f32.mrf.mxu1 }
 0x464   :  { %1478 = vmatmul.mubr.msk.f32.vlgmr.msra.gmra.mxu1 %vm141_vm0, %v1469_v8 }
 0x465   :  { %v1060_v2 = vpop.f32.mrf.mxu1 }
 0x466   :  { %1473 = vmatmul.mubr.msk.f32.vlgmr.msra.gmra.mxu0 %vm141_vm0, %v1060_v2 }
 0x467   :  { %1630 = shalt.err (!%p1627_p1)
}
 0x468   :  { %1245 = dma.vmem_to_hbm [thread:$0]  %s1240_s4, 256, %s1851_s5, [#allocation4], %s1671_s26, %s1671_s26, %s1672_s27   ;;  %v1230_v22 = vld [vmem:[#allocation7 + $0x8] sm:$0xff]  ;;  %v1148_v28 = vld [vmem:[#allocation7] sm:$0xff] }
 0x469   :  { %s1679_s24 = smov [#allocation12]  }
 0x46a   :  { %s1251_s25 = sshll.u32 %s1679_s24, 4  ;;  %s1252_s25 = int_to_ptr.vmem [resolvable:$true] %s1251_s25 }
 0x46b   :  { %s1639_s5 = scalar_lea.vmem %s1252_s25, 256  ;;  %p1644_p3 = scmp.lt.s32.totalorder %s1252_s25, %s1252_s25 }
 0x46c   :  { %p1640_p2 = scmp.ne.s32.totalorder %s1252_s25, %s1639_s5  ;;  %p1645_p4 = scmp.lt.s32.totalorder %s1639_s5, %s1639_s5 }
 0x46e   :  { %p1646_p5 = por %p1645_p4, %p1644_p3 }
 0x470   :  { %p1647_p6 = pnand %p1646_p5, %p1640_p2 }
 0x524   :  { %v1219_v35 = vpop.f32.mrf.mxu1 }
 0x525   :  { %v1298_v13 = vmul.f32 -1.442695, %v1219_v35 }
 0x526   :  { %v1138_v14 = vpop.f32.mrf.mxu0  ;;  %v1479_v15 = vpop.f32.mrf.mxu1 }
 0x527   :  { %1511 = vpow2.f32 %v1298_v13  ;;  %v1295_v16 = vmul.f32 -1.442695, %v1138_v14 }
 0x528   :  { %v1474_v17 = vpop.f32.mrf.mxu0 }
 0x529   :  { %1513 = vpow2.f32 %v1295_v16 }
 0x534   :  { %v1512_v18 = vpop.eup %1511 }
 0x535   :  { %v1226_v19 = vadd.f32 1.0, %v1512_v18 }
 0x536   :  { %v1514_v20 = vpop.eup %1513 }
 0x537   :  { %1515 = vrcp.f32 %v1226_v19  ;;  %v1145_v21 = vadd.f32 1.0, %v1514_v20 }
 0x539   :  { %1517 = vrcp.f32 %v1145_v21 }
 0x544   :  { %v1516_v25 = vpop.eup %1515 }
 0x545   :  { %v1231_v29 = vmul.f32 %v1516_v25, %v1230_v22 }
 0x546   :  { %v1518_v30 = vpop.eup %1517 }
 0x547   :  { %v1149_v31 = vmul.f32 %v1518_v30, %v1148_v28  ;;  %1233 = vst.msk [vmem:[#allocation12 + $0x8] sm:$0xff] %vm550_vm2, %v1231_v29 }
 0x549   :  { %1232 = vst.msk [vmem:[#allocation12] sm:$0xff] %vm550_vm2, %v1149_v31 }
 0x54a   :  { %1650 = shalt.err (!%p1647_p6)
}
 0x54b   :  { %1257 = dma.vmem_to_hbm [thread:$0]  %s1252_s25, 256, %s1852_s6, [#allocation13], %s1671_s26, %s1671_s26, %s1672_s27  }
 0x54c   :  { %1665 = dma.done.wait [#allocation4], 256  }
 0x54d   :  { %1666 = vsyncadd [#allocation4], 4294967040 }
 0x54e   :  { %1667 = dma.done.wait [#allocation13], 256  }
 0x54f   :  { %1668 = vsyncadd [#allocation13], 4294967040 }
 0x550   :  { %1264 = vsyncpa [#allocation3], 1 }
 0x551   :  { %1265 = vsyncpa [#allocation6], 1 }
 0x552   :  { %1266 = vsyncpa [#allocation9], 1 }
 0x553   :  { %1267 = vsyncpa [#allocation4], 1 }
 0x554   :  { %1268 = vsyncpa [#allocation13], 1 }

</bundles_post_ra>
